<compile_context>
chip_gen: v6e
topology: v6e:2x2x1
jax: 0.10.0
libtpu: 0.0.40
codegen_flags: <defaults>
</compile_context>

<pallas_src>
import jax
import jax.numpy as jnp
from jax.experimental import pallas as pl
from jax.experimental.pallas import tpu as pltpu

# -------------------- config (synthetic, small) --------------------
NUM_CLASSES = 8
CLS_AGNOSTIC_BBOX_REG = False
BBOX_OUT = 4 * 2 if CLS_AGNOSTIC_BBOX_REG else 4 * NUM_CLASSES


# -------------------- Pallas kernels --------------------
def _box_output_pool_kernel(x_ref, w_ref, b_ref, out_ref):
    # x_ref : (TILE_N, C, HW)   NCHW-native layout; HW on lanes, C on sublanes
    # w_ref : (C, OUT_PAD)      pre-transposed, fused, pre-scaled by 1/HW
    # b_ref : (1, OUT_PAD)
    # out_ref: (TILE_N, OUT_PAD)
    pooled = jnp.sum(x_ref[...], axis=-1, dtype=jnp.float32)      # (TILE_N, C)
    out = jnp.dot(pooled, w_ref[...], preferred_element_type=jnp.float32)
    out = out + b_ref[...].astype(jnp.float32)
    out_ref[...] = out.astype(out_ref.dtype)


def _box_output_nopool_kernel(x_ref, w_ref, b_ref, out_ref):
    # x_ref : (TILE_N, C)   already-pooled features -> matmul-only fast path
    out = jnp.dot(x_ref[...], w_ref[...], preferred_element_type=jnp.float32)
    out = out + b_ref[...].astype(jnp.float32)
    out_ref[...] = out.astype(out_ref.dtype)


# -------------------- tiling helpers --------------------
def _vmem_capacity_bytes():
    try:
        return int(pltpu.get_tpu_info().vmem_capacity_bytes)
    except Exception:
        return 64 << 20          # v7x-sized conservative fallback (safe everywhere)


def _pick_tile_n(n, row_bytes, sublane, vmem_cap):
    """Largest sublane-aligned N-tile whose x block fits a per-buffer budget.

    Per-x-buffer budget ~= VMEM/5 so that 2x double-buffered x tiles + resident
    weights + 2x out tiles + internal scratch stay inside the scoped limit:
      v5e/v6e (128 MiB) -> ~24 MiB per buffer; v7x (64 MiB) -> ~12 MiB.
    """
    budget = max(4 << 20, min(vmem_cap // 5, 24 << 20))
    t = max(sublane, budget // max(1, row_bytes))
    t = min(t, 1024)
    t = max(sublane, (t // sublane) * sublane)
    if t >= n:
        if n >= 2 * sublane:
            # Split into >=2 grid steps so "parallel" shards across both
            # TensorCores on v7x (negligible per-step cost on v5e/v6e).
            half = -(-n // 2)
            t = -(-half // sublane) * sublane
        else:
            t = n                 # single block == full N dim (tiny inputs)
    return t


# -------------------- wrapper --------------------
def box_output(x, w_cls, b_cls, w_bbox, b_bbox):
    """x: (N, C, H, W) NCHW  or  (N, C).  Returns (cls_score, bbox_pred)."""
    num_classes = w_cls.shape[0]
    bbox_out = w_bbox.shape[0]
    out_total = num_classes + bbox_out
    out_dtype = jnp.result_type(x.dtype, w_cls.dtype)
    out_pad = max(128, -(-out_total // 128) * 128)      # lane-dense output width

    # Pre-transpose + fuse the two linear layers once (tiny) and zero-pad the
    # output dim to a full lane width -> unmasked vst stores in the kernel.
    w_fused = jnp.concatenate([w_cls.T, w_bbox.T], axis=1)        # (C, OUT_TOTAL)
    b_fused = jnp.concatenate([b_cls, b_bbox])                    # (OUT_TOTAL,)
    if out_pad != out_total:
        w_fused = jnp.pad(w_fused, ((0, 0), (0, out_pad - out_total)))
        b_fused = jnp.pad(b_fused, ((0, out_pad - out_total),))
    b_fused = b_fused.reshape(1, out_pad)

    if x.ndim == 4:
        n, c, h, w = x.shape
        hw = h * w
        x_in = x.reshape(n, c, hw)               # free metadata reshape, no copy
        # Fold the 1/HW mean scale into the weights (bias untouched).
        w_in = w_fused * jnp.asarray(1.0 / hw, dtype=w_fused.dtype)
        row_bytes = c * hw * x.dtype.itemsize
        kernel = _box_output_pool_kernel
        pool_flops = n * c * hw
    elif x.ndim == 2:
        n, c = x.shape
        x_in = x
        w_in = w_fused
        row_bytes = c * x.dtype.itemsize
        kernel = _box_output_nopool_kernel
        pool_flops = 0
    else:
        raise ValueError("expected 2-D or 4-D input")

    # Dtype-aware sublane alignment for tiled N blocks (8 f32, 16 bf16, 32 i8).
    min_itemsize = min(x.dtype.itemsize, jnp.dtype(out_dtype).itemsize, 4)
    sublane = 8 * (4 // min_itemsize)

    vmem_cap = _vmem_capacity_bytes()
    tile_n = _pick_tile_n(n, row_bytes, sublane, vmem_cap)
    grid = (pl.cdiv(n, tile_n),)                 # partial last block: masked writes

    if x.ndim == 4:
        x_spec = pl.BlockSpec((tile_n, c, hw), lambda i: (i, 0, 0))
    else:
        x_spec = pl.BlockSpec((tile_n, c), lambda i: (i, 0))
    # TODO(synk): add pipeline_mode=pl.Buffered(3) on x_spec only if a trace
    # still shows exposed DMA on the x stream after the larger tiles.

    # Explicit scoped-VMEM limit: 2x double-buffered x + 2x out + resident w/b,
    # plus headroom; capped at 3/4 of physical VMEM (96 MiB v5e/v6e, 48 MiB v7x).
    x_tile_bytes = tile_n * row_bytes
    out_tile_bytes = tile_n * out_pad * jnp.dtype(out_dtype).itemsize
    wb_bytes = (w_in.size * w_in.dtype.itemsize
                + b_fused.size * b_fused.dtype.itemsize)
    needed = 2 * x_tile_bytes + 2 * out_tile_bytes + wb_bytes
    vmem_limit = int(min(max(needed + (4 << 20), 16 << 20), (vmem_cap * 3) // 4))

    cost = pl.CostEstimate(
        flops=2 * n * c * out_total + pool_flops,
        transcendentals=0,
        bytes_accessed=(x_in.size * x_in.dtype.itemsize
                        + w_in.size * w_in.dtype.itemsize
                        + b_fused.size * b_fused.dtype.itemsize
                        + n * out_pad * jnp.dtype(out_dtype).itemsize),
    )

    fused_out = pl.pallas_call(
        kernel,
        out_shape=jax.ShapeDtypeStruct((n, out_pad), out_dtype),
        grid=grid,
        in_specs=[
            x_spec,
            # Weights/bias: constant index map -> resident across grid steps.
            pl.BlockSpec((c, out_pad), lambda i: (0, 0)),
            pl.BlockSpec((1, out_pad), lambda i: (0, 0)),
        ],
        out_specs=pl.BlockSpec((tile_n, out_pad), lambda i: (i, 0)),
        compiler_params=pltpu.CompilerParams(
            dimension_semantics=("parallel",),
            vmem_limit_bytes=vmem_limit),
        cost_estimate=cost,
    )(x_in, w_in, b_fused)

    # Free XLA slices: split the fused output and drop the lane padding.
    cls_score = fused_out[:, :num_classes]
    bbox_pred = fused_out[:, num_classes:out_total]
    return cls_score, bbox_pred


# -------------------- reference (plain JAX) --------------------
def box_output_ref(x, w_cls, b_cls, w_bbox, b_bbox):
    if x.ndim == 4:
        x = jnp.mean(x, axis=(2, 3))
    cls = x @ w_cls.T + b_cls
    bbox = x @ w_bbox.T + b_bbox
    return cls, bbox


if __name__ == "__main__":
    key = jax.random.PRNGKey(0)
    k_x, k_wc, k_wb = jax.random.split(key, 3)

    N, C, H, W = 2, 32, 16, 16        # dim_in = 32
    x = jax.random.normal(k_x, (N, C, H, W), dtype=jnp.float32)

    # deterministic parameter init matching _init_weights (std=0.01 / 0.001, bias=0)
    w_cls = 0.01 * jax.random.normal(k_wc, (NUM_CLASSES, C), dtype=jnp.float32)
    b_cls = jnp.zeros((NUM_CLASSES,), dtype=jnp.float32)
    w_bbox = 0.001 * jax.random.normal(k_wb, (BBOX_OUT, C), dtype=jnp.float32)
    b_bbox = jnp.zeros((BBOX_OUT,), dtype=jnp.float32)

    # 4-D path (in-kernel global average pool + fused linears)
    cls_score, bbox_pred = box_output(x, w_cls, b_cls, w_bbox, b_bbox)
    jax.block_until_ready((cls_score, bbox_pred))

    cls_ref, bbox_ref = box_output_ref(x, w_cls, b_cls, w_bbox, b_bbox)
    assert cls_score.shape == (N, NUM_CLASSES)
    assert bbox_pred.shape == (N, BBOX_OUT)
    assert jnp.allclose(cls_score, cls_ref, atol=2e-5, rtol=1e-4)
    assert jnp.allclose(bbox_pred, bbox_ref, atol=2e-5, rtol=1e-4)

    # 2-D fast path (already-pooled features)
    x2 = jnp.mean(x, axis=(2, 3))
    cls2, bbox2 = box_output(x2, w_cls, b_cls, w_bbox, b_bbox)
    jax.block_until_ready((cls2, bbox2))
    cls2_ref, bbox2_ref = box_output_ref(x2, w_cls, b_cls, w_bbox, b_bbox)
    assert jnp.allclose(cls2, cls2_ref, atol=2e-5, rtol=1e-4)
    assert jnp.allclose(bbox2, bbox2_ref, atol=2e-5, rtol=1e-4)

    print("KERNEL_OK")
</pallas_src>

<mosaic_0001>
module attributes {stable_mosaic.version = 11 : i64} {
  func.func @_box_output_pool_kernel(%arg0: i32, %arg1: memref<2x32x256xf32, #tpu.memory_space<vmem>>, %arg2: memref<32x128xf32, #tpu.memory_space<vmem>>, %arg3: memref<1x128xf32, #tpu.memory_space<vmem>>, %arg4: memref<2x128xf32, #tpu.memory_space<vmem>>) attributes {dimension_semantics = [#tpu.dimension_semantics<parallel>], iteration_bounds = array<i64: 1>, scalar_prefetch = 0 : i64, scratch_operands = 0 : i64, tpu.core_type = #tpu.core_type<tc>, window_params = [{transform_indices = @transform_0, window_bounds = array<i64: 2, 32, 256>}, {pipeline_mode = #tpu.pipeline_mode<synchronous>, transform_indices = @transform_1, window_bounds = array<i64: 32, 128>}, {pipeline_mode = #tpu.pipeline_mode<synchronous>, transform_indices = @transform_2, window_bounds = array<i64: 1, 128>}, {transform_indices = @transform_3, window_bounds = array<i64: 2, 128>}]} {
    %c0 = arith.constant 0 : index
    %c0_0 = arith.constant 0 : index
    %c0_1 = arith.constant 0 : index
    %0 = vector.load %arg1[%c0, %c0_0, %c0_1] : memref<2x32x256xf32, #tpu.memory_space<vmem>>, vector<2x32x256xf32>
    %cst = arith.constant dense<0.000000e+00> : vector<2x32xf32>
    %1 = vector.multi_reduction <add>, %0, %cst [2] : vector<2x32x256xf32> to vector<2x32xf32>
    %c0_2 = arith.constant 0 : index
    %c0_3 = arith.constant 0 : index
    %2 = vector.load %arg2[%c0_2, %c0_3] : memref<32x128xf32, #tpu.memory_space<vmem>>, vector<32x128xf32>
    %cst_4 = arith.constant dense<0.000000e+00> : vector<2x128xf32>
    %3 = tpu.matmul %1, %2, %cst_4 {dimension_numbers = #tpu.dot_dimension_numbers<[1], [0], [0], [1], [0, 0, 1, 1], [], []>} : vector<2x32xf32>, vector<32x128xf32>, vector<2x128xf32> -> vector<2x128xf32>
    %c0_5 = arith.constant 0 : index
    %c0_6 = arith.constant 0 : index
    %4 = vector.load %arg3[%c0_5, %c0_6] : memref<1x128xf32, #tpu.memory_space<vmem>>, vector<1x128xf32>
    %5 = vector.broadcast %4 : vector<1x128xf32> to vector<2x128xf32>
    %6 = arith.addf %3, %5 : vector<2x128xf32>
    %c0_7 = arith.constant 0 : index
    %c0_8 = arith.constant 0 : index
    %7 = vector.load %arg4[%c0_7, %c0_8] : memref<2x128xf32, #tpu.memory_space<vmem>>, vector<2x128xf32>
    tpu.vector_store %arg4[%c0_7, %c0_8], %6 {strides = array<i32>} : memref<2x128xf32, #tpu.memory_space<vmem>>, vector<2x128xf32>,
    return
  }
  func.func @transform_0(%arg0: i32) -> (i32, i32, i32) {
    %c0_i32 = arith.constant 0 : i32
    %c0_i32_0 = arith.constant 0 : i32
    %c0_i32_1 = arith.constant 0 : i32
    return %arg0, %c0_i32, %c0_i32_0 : i32, i32, i32
  }
  func.func @transform_1(%arg0: i32) -> (i32, i32) {
    %c0_i32 = arith.constant 0 : i32
    %c0_i32_0 = arith.constant 0 : i32
    %c0_i32_1 = arith.constant 0 : i32
    return %c0_i32, %c0_i32_0 : i32, i32
  }
  func.func @transform_2(%arg0: i32) -> (i32, i32) {
    %c0_i32 = arith.constant 0 : i32
    %c0_i32_0 = arith.constant 0 : i32
    %c0_i32_1 = arith.constant 0 : i32
    return %c0_i32, %c0_i32_0 : i32, i32
  }
  func.func @transform_3(%arg0: i32) -> (i32, i32) {
    %c0_i32 = arith.constant 0 : i32
    %c0_i32_0 = arith.constant 0 : i32
    return %arg0, %c0_i32 : i32, i32
  }
}

</mosaic_0001>

<bundles_post_ra>
// kernel: tpu_custom_call.1
= control target key start
LH: loop header
LB: loop body
LE: loop exit
PB: predicated region body
PF: predicated region fallthrough
CT: control target
= control target key end

     0   :  { %8 = vsyncpa [#allocation3], 0  ;;  %s374_s0 = inlined_call_operand.hbm [shape: f32[2,32,256], index: 0, kind: input, shape index: {}]   ;;  %s375_s1 = inlined_call_operand.hbm [shape: f32[32,128], index: 1, kind: input, shape index: {}]   ;;  %s376_s2 = inlined_call_operand.vmem [shape: f32[1,128], index: 2, kind: input, shape index: {}]   ;;  %s377_s3 = inlined_call_operand.hbm [shape: f32[2,128], index: 3, kind: output, shape index: {}]  }
   0x1   :  { %9 = vsyncpa [#allocation6], 0 }
   0x2   :  { %10 = vsyncpa [#allocation4], 0  ;;  %s333_s12 = smov [#allocation2]  }
   0x3   :  { %s16_s13 = sshll.u32 %s333_s12, 4  ;;  %s17_s13 = int_to_ptr.vmem [resolvable:$true] %s16_s13 }
   0x4   :  { %s275_s14 = scalar_lea.vmem %s17_s13, 2048  ;;  %p280_p1 = scmp.lt.s32.totalorder %s17_s13, %s17_s13 }
   0x5   :  { %p276_p0 = scmp.ne.s32.totalorder %s17_s13, %s275_s14  ;;  %p281_p2 = scmp.lt.s32.totalorder %s275_s14, %s275_s14 }
   0x7   :  { %p282_p3 = por %p281_p2, %p280_p1 }
   0x9   :  { %p283_p4 = pnand %p282_p3, %p276_p0 }
   0xb   :  { %286 = shalt.err (!%p283_p4)
}
   0xc   :  { %s334_s15 = smov 256   ;;  %s335_s16 = smov 16  }
   0xd   :  { %22 = dma.hbm_to_vmem [thread:$0]  %s374_s0, 2048, %s17_s13, [#allocation3], %s334_s15, %s334_s15, %s335_s16  }
   0xe   :  { %s336_s19 = smov [#allocation5]  }
   0xf   :  { %s28_s20 = sshll.u32 %s336_s19, 4  ;;  %s29_s20 = int_to_ptr.vmem [resolvable:$true] %s28_s20 }
  0x10   :  { %s295_s21 = scalar_lea.vmem %s29_s20, 512  ;;  %p300_p6 = scmp.lt.s32.totalorder %s29_s20, %s29_s20 }
  0x11   :  { %p296_p5 = scmp.ne.s32.totalorder %s29_s20, %s295_s21  ;;  %p301_p7 = scmp.lt.s32.totalorder %s295_s21, %s295_s21 }
  0x13   :  { %p302_p8 = por %p301_p7, %p300_p6 }
  0x15   :  { %p303_p9 = pnand %p302_p8, %p296_p5 }
  0x17   :  { %306 = shalt.err (!%p303_p9)
}
  0x18   :  { %s337_s22 = smov 128   ;;  %s338_s23 = smov 8  }
  0x19   :  { %34 = dma.hbm_to_vmem [thread:$0]  %s375_s1, 512, %s29_s20, [#allocation6], %s337_s22, %s337_s22, %s338_s23  }
  0x1a   :  { %327 = dma.done.wait [#allocation3], 2048  }
  0x1b   :  { %328 = vsyncadd [#allocation3], 4294965248 }
  0x1c   :  { %329 = dma.done.wait [#allocation6], 512  }
  0x1d   :  { %330 = vsyncadd [#allocation6], 4294966784  ;;  %v51_v0 = vld [vmem:[#allocation2 + $0x40] sm:$0xff]  ;;  %v52_v1 = vld [vmem:[#allocation2 + $0x48] sm:$0xff]  ;;  %v339_v24 = vmov 0.0   ;;  %vm340_vm0 = vmmov 0   ;;  %v102_v29 = vlaneseq }
  0x1e   :  { %v43_v2 = vld [vmem:[#allocation2] sm:$0xff]  ;;  %v71_v3 = vadd.f32 %v52_v1, %v51_v0  ;;  %v44_v4 = vld [vmem:[#allocation2 + $0x8] sm:$0xff]  ;;  %v53_v5 = vld [vmem:[#allocation2 + $0x50] sm:$0xff]  ;;  %247 = vmatprep.subr.mxu0 %v339_v24  ;;  %255 = vmatprep.mubr.msk.f32.mxu0 %vm340_vm0, %v339_v24  ;;  %vm113_vm1 = vcmask 130112   ;;  %vm120_vm2 = vcmask 195712   ;;  %vm127_vm3 = vcmask 261312  }
  0x1f   :  { %v54_v6 = vld [vmem:[#allocation2 + $0x58] sm:$0xff]  ;;  %v59_v7 = vadd.f32 %v44_v4, %v43_v2  ;;  %v45_v8 = vld [vmem:[#allocation2 + $0x10] sm:$0xff]  ;;  %v55_v12 = vld [vmem:[#allocation2 + $0x60] sm:$0xff]  ;;  %v103_v30 = vand.u32 127, %v102_v29  ;;  %v105_v35 = vshrl.u32 %v102_v29, 7  ;;  %vm148_vm4 = vcmask 1041409  }
  0x20   :  { %v46_v9 = vld [vmem:[#allocation2 + $0x18] sm:$0xff]  ;;  %72 = vadd.xlane.f32.xlu1 %v71_v3  ;;  %v74_v10 = vadd.f32 %v54_v6, %v53_v5  ;;  %v56_v13 = vld [vmem:[#allocation2 + $0x68] sm:$0xff]  ;;  %v47_v14 = vld [vmem:[#allocation2 + $0x20] sm:$0xff]  ;;  %vm150_vm5 = vcmask 261120   ;;  %s341_s26 = smov [#allocation7]  }
  0x21   :  { %60 = vadd.xlane.f32.xlu0 %v59_v7  ;;  %v62_v11 = vadd.f32 %v46_v9, %v45_v8  ;;  %v48_v15 = vld [vmem:[#allocation2 + $0x28] sm:$0xff]  ;;  %v77_v16 = vadd.f32 %v56_v13, %v55_v12  ;;  %v57_v18 = vld [vmem:[#allocation2 + $0x70] sm:$0xff]  ;;  %v58_v19 = vld [vmem:[#allocation2 + $0x78] sm:$0xff]  ;;  %v108_v33 = vadd.s32 4294967288, %v103_v30  ;;  %v115_v34 = vadd.s32 4294967280, %v103_v30  ;;  %s230_s27 = sshll.u32 %s341_s26, 4  ;;  %s231_s27 = int_to_ptr.vmem [resolvable:$true] %s230_s27 }
  0x22   :  { %v65_v17 = vadd.f32 %v48_v15, %v47_v14  ;;  %v49_v20 = vld [vmem:[#allocation2 + $0x30] sm:$0xff]  ;;  %v50_v21 = vld [vmem:[#allocation2 + $0x38] sm:$0xff]  ;;  %v80_v22 = vadd.f32 %v58_v19, %v57_v18  ;;  %v84_v27 = vld [vmem:[#allocation5 + $0x8] sm:$0xff]  ;;  %v122_v39 = vadd.s32 4294967272, %v103_v30  ;;  %v106_v41 = vsub.s32 %v103_v30, %v105_v35  ;;  %s307_s28 = scalar_lea.vmem %s231_s27, 32  ;;  %p312_p11 = scmp.lt.s32.totalorder %s231_s27, %s231_s27 }
  0x23   :  { %v68_v23 = vadd.f32 %v50_v21, %v49_v20  ;;  %v86_v25 = vld [vmem:[#allocation5 + $0x18] sm:$0xff]  ;;  %v85_v26 = vld [vmem:[#allocation5 + $0x10] sm:$0xff]  ;;  %v83_v28 = vld [vmem:[#allocation5] sm:$0xff]  ;;  %v111_v37 = vsub.s32 %v108_v33, %v105_v35  ;;  %v118_v40 = vsub.s32 %v115_v34, %v105_v35  ;;  %p308_p10 = scmp.ne.s32.totalorder %s231_s27, %s307_s28  ;;  %p313_p12 = scmp.lt.s32.totalorder %s307_s28, %s307_s28 }
  0x24   :  { %75 = vadd.xlane.f32.xlu1 %v74_v10  ;;  %248 = vmatpush3.msra.mxu0 %v86_v25  ;;  %v125_v45 = vsub.s32 %v122_v39, %v105_v35  ;;  %v240_v62 = vld [vmem:[%s376_s2] ss:$0 sm:$0xff] }
  0x25   :  { %63 = vadd.xlane.f32.xlu0 %v62_v11  ;;  %249 = vmatprep.subr.mxu0 %v339_v24  ;;  %p314_p13 = por %p313_p12, %p312_p11 }
  0x26   :  { %250 = vmatpush3.msra.mxu0 %v85_v26 }
  0x27   :  { %251 = vmatprep.subr.mxu0 %v339_v24  ;;  %p315_p0 = pnand %p314_p13, %p308_p10 }
  0x28   :  { %78 = vadd.xlane.f32.xlu1 %v77_v16  ;;  %252 = vmatpush3.msra.mxu0 %v84_v27 }
  0x29   :  { %66 = vadd.xlane.f32.xlu0 %v65_v17  ;;  %253 = vmatprep.subr.mxu0 %v339_v24 }
  0x2a   :  { %254 = vmatpush3.msra.mxu0 %v83_v28 }
  0x2c   :  { %81 = vadd.xlane.f32.xlu1 %v80_v22 }
  0x2d   :  { %69 = vadd.xlane.f32.xlu0 %v68_v23 }
  0xa9   :  { %v73_v31 = vpop.xlane.xlu1 %72 }
  0xaa   :  { %v61_v32 = vpop.xlane.xlu0 %60  ;;  %v132_v48 = vrot.slane %v73_v31, %v106_v41 }
  0xab   :  { %v107_v50 = vrot.slane %v61_v32, %v106_v41 }
  0xad   :  { %v76_v36 = vpop.xlane.xlu1 %75 }
  0xae   :  { %v64_v38 = vpop.xlane.xlu0 %63  ;;  %v136_v43 = vrot.slane %v76_v36, %v111_v37 }
  0xaf   :  { %v112_v46 = vrot.slane %v64_v38, %v111_v37 }
  0xb0   :  { %v137_v52 = vsel %vm113_vm1, %v136_v43, %v132_v48 }
  0xb1   :  { %v79_v42 = vpop.xlane.xlu1 %78  ;;  %v114_v55 = vsel %vm113_vm1, %v112_v46, %v107_v50 }
  0xb2   :  { %v67_v44 = vpop.xlane.xlu0 %66  ;;  %v141_v47 = vrot.slane %v79_v42, %v118_v40 }
  0xb3   :  { %v119_v49 = vrot.slane %v67_v44, %v118_v40 }
  0xb4   :  { %v142_v56 = vsel %vm120_vm2, %v141_v47, %v137_v52 }
  0xb5   :  { %v82_v51 = vpop.xlane.xlu1 %81  ;;  %v121_v58 = vsel %vm120_vm2, %v119_v49, %v114_v55 }
  0xb6   :  { %v146_v53 = vrot.slane %v82_v51, %v125_v45  ;;  %v70_v54 = vpop.xlane.xlu0 %69 }
  0xb7   :  { %v126_v57 = vrot.slane %v70_v54, %v125_v45 }
  0xb8   :  { %v147_v59 = vsel %vm127_vm3, %v146_v53, %v142_v56 }
  0xb9   :  { %v128_v60 = vsel %vm127_vm3, %v126_v57, %v121_v58 }
  0xba   :  { %v149_v61 = vsel %vm148_vm4, %v147_v59, %v128_v60 }
  0xbb   :  { %256 = vmatmul.mubr.msk.f32.vlgmr.msra.gmra.mxu0 %vm150_vm5, %v149_v61 }
 0x17b   :  { %v219_v63 = vpop.f32.mrf.mxu0 }
 0x17c   :  { %v220_v0 = vadd.f32 %v240_v62, %v219_v63 }
 0x17d   :  { %v257_v1 = vpop.f32.mrf.mxu0 }
 0x17e   :  { %223 = vst [vmem:[#allocation7] sm:$0x3] %v220_v0 }
 0x17f   :  { %318 = shalt.err (!%p315_p0)
}
 0x180   :  { %233 = dma.vmem_to_hbm [thread:$0]  %s231_s27, 32, %s377_s3, [#allocation4]  }
 0x181   :  { %331 = dma.done.wait [#allocation4], 32  }
 0x182   :  { %332 = vsyncadd [#allocation4], 4294967264 }
 0x183   :  { %237 = vsyncpa [#allocation3], 1 }
 0x184   :  { %238 = vsyncpa [#allocation6], 1 }
 0x185   :  { %239 = vsyncpa [#allocation4], 1 }

</bundles_post_ra>
